<compile_context>
chip_gen: v7x
topology: tpu7x:2x2x1
jax: 0.10.0
libtpu: 0.0.40
codegen_flags: <defaults>
</compile_context>

<pallas_src>
import numpy as np
import jax
import jax.numpy as jnp
from jax.experimental import pallas as pl
from jax.experimental.pallas import tpu as pltpu

# ARIMA hyper-parameters (the nn.Module __init__ args: p, d, q, i)
P, D, Q, I = 3, 1, 2, 2
T = 128  # sequence length (whole series kept lane-contiguous in one block)

ROW_BLOCK_MAX = 4096          # 4096 rows * 128 lanes * 4 B = 2 MiB per pipelined window
VMEM_BUDGET_BYTES = 12 << 20  # stay under v5e's 16 MiB default scoped VMEM (4 windows)


def _round_up(a, b):
    return (a + b - 1) // b * b


def _choose_block_rows(B, T_):
    """Pick a row-block size: big enough to amortize per-step overhead, small enough
    for VMEM, and yielding >= 2 grid blocks when possible (v7x has 2 TensorCores)."""
    rows8 = _round_up(max(B, 1), 8)
    bytes_per_row = T_ * 4
    # in + out, double-buffered => 4 pipelined VMEM windows of block_rows * bytes_per_row.
    vmem_rows = max(8, (VMEM_BUDGET_BYTES // (4 * bytes_per_row)) // 8 * 8)
    block_rows = min(ROW_BLOCK_MAX, vmem_rows, rows8)
    if rows8 > 8:
        # Ensure at least two row blocks so both TCs get work on v7x.
        block_rows = min(block_rows, _round_up(pl.cdiv(rows8, 2), 8))
    return block_rows


def arima_kernel(params_ref, x_ref, o_ref):
    # params_ref: (P+Q+1,) f32 SMEM = [ar(P) | ma(Q) | constant]
    # x_ref / o_ref: (block_rows, T) f32 VMEM; each sublane row is one series.
    x = x_ref[...]
    t_idx = jax.lax.broadcasted_iota(jnp.int32, x.shape, dimension=1)

    # TODO(synk): the torch.diff 'dif' tensor (order d differencing) in the reference
    # forward is unused dead code, so it is intentionally not computed here.

    # ar_component[t] = sum_{s=1..P} ar[P-s] * x[t-s]
    # ma_component[t] = sum_{s=1..Q} ma[Q-s] * x[t-s]
    # Shared rolls: one XLU rotation per lag s feeds both accumulators.
    ar_acc = jnp.zeros_like(x)
    ma_acc = jnp.zeros_like(x)
    for s in range(1, max(P, Q) + 1):
        xs = pltpu.roll(x, shift=s, axis=1)
        if s <= P:
            ar_acc = ar_acc + params_ref[P - s] * xs
        if s <= Q:
            ma_acc = ma_acc + params_ref[P + Q - s] * xs

    # Wrap-around lanes (t < s <= P <= I+P) are always inside the masked region, and
    # jnp.where (not mask*acc) keeps NaN/Inf from the wrapped lanes from leaking in.
    zero = jnp.zeros_like(x)
    pred = (params_ref[P + Q]
            + jnp.where(t_idx >= I + P, ar_acc, zero)
            + jnp.where(t_idx >= I + Q, ma_acc, zero))

    # first I entries are copied straight from x
    o_ref[...] = jnp.where(t_idx < I, x, pred)


@jax.jit
def arima_forward(x, ar_params, ma_params, constant):
    """ARIMA forward for a single (T,) series or a batch (B, T) of independent series."""
    x = jnp.asarray(x, jnp.float32)
    squeeze = x.ndim == 1
    x2d = x[None, :] if squeeze else x
    B, T_ = x2d.shape

    # Pack all scalar parameters into one SMEM array.
    params = jnp.concatenate([
        jnp.asarray(ar_params, jnp.float32).reshape(P),
        jnp.asarray(ma_params, jnp.float32).reshape(Q),
        jnp.asarray(constant, jnp.float32).reshape(1),
    ])

    block_rows = _choose_block_rows(B, T_)
    # Ragged tail handled by Pallas' partial/masked boundary block: no jnp.pad copy
    # of the whole array, and no out[:B] slicing pass afterwards.
    grid = (pl.cdiv(B, block_rows),)

    # TODO(synk): if T ever stops being a multiple of 128, pad the time axis in the
    # wrapper so output stores stay lane-dense (unmasked vst).
    out = pl.pallas_call(
        arima_kernel,
        out_shape=jax.ShapeDtypeStruct((B, T_), jnp.float32),
        grid=grid,
        in_specs=[
            pl.BlockSpec(memory_space=pltpu.MemorySpace.SMEM),   # packed scalar params
            pl.BlockSpec((block_rows, T_), lambda r: (r, 0)),    # x row block
        ],
        out_specs=pl.BlockSpec((block_rows, T_), lambda r: (r, 0)),
        compiler_params=pltpu.CompilerParams(
            dimension_semantics=("parallel",),   # v7x: shard row blocks over both TCs
        ),
    )(params, x2d)

    return out[0] if squeeze else out


def arima_reference(x, ar, ma, c):
    """Pure-numpy transcription of the PyTorch forward (single series)."""
    x = np.asarray(x, np.float32)
    ar = np.asarray(ar, np.float32)
    ma = np.asarray(ma, np.float32)
    c = np.asarray(c, np.float32)
    n = x.shape[0]
    ar_comp = np.zeros_like(x)
    for t in range(I + P, n):
        ar_comp[t] = np.dot(ar, x[t - P:t])
    ma_comp = np.zeros_like(x)
    for t in range(I + Q, n):
        ma_comp[t] = np.dot(ma, x[t - Q:t])
    pred = c[0] + ar_comp + ma_comp
    pred[:I] = x[:I]
    return pred


if __name__ == "__main__":
    key = jax.random.PRNGKey(0)
    kx, kar, kma, kc = jax.random.split(key, 4)

    B = 16  # small batch of independent series -> 2 row blocks of 8 (both TCs on v7x)
    xb = jax.random.normal(kx, (B, T), dtype=jnp.float32)
    ar_params = jax.random.normal(kar, (P,), dtype=jnp.float32)   # nn.Parameter(torch.randn(p))
    ma_params = jax.random.normal(kma, (Q,), dtype=jnp.float32)   # nn.Parameter(torch.randn(q))
    constant = jax.random.normal(kc, (1,), dtype=jnp.float32)     # nn.Parameter(torch.randn(1))

    # batched path
    out_b = jax.block_until_ready(arima_forward(xb, ar_params, ma_params, constant))
    ref_b = np.stack([
        arima_reference(np.asarray(xb[b]), np.asarray(ar_params),
                        np.asarray(ma_params), np.asarray(constant))
        for b in range(B)
    ])
    np.testing.assert_allclose(np.asarray(out_b), ref_b, rtol=1e-5, atol=1e-5)

    # single 1-D series path (matches the nn.Module forward signature); exercises
    # the ragged (B=1 < block_rows=8) boundary-block handling.
    out_1 = jax.block_until_ready(arima_forward(xb[0], ar_params, ma_params, constant))
    np.testing.assert_allclose(np.asarray(out_1), ref_b[0], rtol=1e-5, atol=1e-5)

    print("KERNEL_OK")
</pallas_src>

<mosaic_0001>
module attributes {stable_mosaic.version = 11 : i64} {
  func.func @arima_kernel(%arg0: i32, %arg1: memref<6xf32, #tpu.memory_space<smem>>, %arg2: memref<8x128xf32, #tpu.memory_space<vmem>>, %arg3: memref<8x128xf32, #tpu.memory_space<vmem>>) attributes {dimension_semantics = [#tpu.dimension_semantics<parallel>], iteration_bounds = array<i64: 2>, scalar_prefetch = 0 : i64, scratch_operands = 0 : i64, tpu.core_type = #tpu.core_type<tc>, window_params = [{transform_indices = @transform_0, window_bounds = array<i64: 6>}, {transform_indices = @transform_1, window_bounds = array<i64: 8, 128>}, {transform_indices = @transform_2, window_bounds = array<i64: 8, 128>}]} {
    %c0 = arith.constant 0 : index
    %c0_0 = arith.constant 0 : index
    %0 = vector.load %arg2[%c0, %c0_0] : memref<8x128xf32, #tpu.memory_space<vmem>>, vector<8x128xf32>
    %1 = tpu.iota {dimensions = array<i32: 1>} : vector<8x128xi32>
    %cst = arith.constant 0.000000e+00 : f32
    %2 = vector.broadcast %cst : f32 to vector<8x128xf32>
    %cst_1 = arith.constant 0.000000e+00 : f32
    %3 = vector.broadcast %cst_1 : f32 to vector<8x128xf32>
    %c1_i32 = arith.constant 1 : i32
    %4 = tpu.dynamic_rotate %0 by %c1_i32 dim 1 : vector<8x128xf32>, i32 -> vector<8x128xf32>
    %c2 = arith.constant 2 : index
    %5 = memref.load %arg1[%c2] : memref<6xf32, #tpu.memory_space<smem>>
    %6 = vector.broadcast %5 : f32 to vector<8x128xf32>
    %7 = arith.mulf %6, %4 : vector<8x128xf32>
    %8 = arith.addf %2, %7 : vector<8x128xf32>
    %c4 = arith.constant 4 : index
    %9 = memref.load %arg1[%c4] : memref<6xf32, #tpu.memory_space<smem>>
    %10 = vector.broadcast %9 : f32 to vector<8x128xf32>
    %11 = arith.mulf %10, %4 : vector<8x128xf32>
    %12 = arith.addf %3, %11 : vector<8x128xf32>
    %c2_i32 = arith.constant 2 : i32
    %13 = tpu.dynamic_rotate %0 by %c2_i32 dim 1 : vector<8x128xf32>, i32 -> vector<8x128xf32>
    %c1 = arith.constant 1 : index
    %14 = memref.load %arg1[%c1] : memref<6xf32, #tpu.memory_space<smem>>
    %15 = vector.broadcast %14 : f32 to vector<8x128xf32>
    %16 = arith.mulf %15, %13 : vector<8x128xf32>
    %17 = arith.addf %8, %16 : vector<8x128xf32>
    %c3 = arith.constant 3 : index
    %18 = memref.load %arg1[%c3] : memref<6xf32, #tpu.memory_space<smem>>
    %19 = vector.broadcast %18 : f32 to vector<8x128xf32>
    %20 = arith.mulf %19, %13 : vector<8x128xf32>
    %21 = arith.addf %12, %20 : vector<8x128xf32>
    %c3_i32 = arith.constant 3 : i32
    %22 = tpu.dynamic_rotate %0 by %c3_i32 dim 1 : vector<8x128xf32>, i32 -> vector<8x128xf32>
    %c0_2 = arith.constant 0 : index
    %23 = memref.load %arg1[%c0_2] : memref<6xf32, #tpu.memory_space<smem>>
    %24 = vector.broadcast %23 : f32 to vector<8x128xf32>
    %25 = arith.mulf %24, %22 : vector<8x128xf32>
    %26 = arith.addf %17, %25 : vector<8x128xf32>
    %cst_3 = arith.constant 0.000000e+00 : f32
    %27 = vector.broadcast %cst_3 : f32 to vector<8x128xf32>
    %c5 = arith.constant 5 : index
    %28 = memref.load %arg1[%c5] : memref<6xf32, #tpu.memory_space<smem>>
    %c5_i32 = arith.constant 5 : i32
    %29 = vector.broadcast %c5_i32 : i32 to vector<8x128xi32>
    %30 = arith.cmpi sge, %1, %29 : vector<8x128xi32>
    %31 = arith.select %30, %26, %27 : vector<8x128xi1>, vector<8x128xf32>
    %32 = vector.broadcast %28 : f32 to vector<8x128xf32>
    %33 = arith.addf %32, %31 : vector<8x128xf32>
    %c4_i32 = arith.constant 4 : i32
    %34 = vector.broadcast %c4_i32 : i32 to vector<8x128xi32>
    %35 = arith.cmpi sge, %1, %34 : vector<8x128xi32>
    %36 = arith.select %35, %21, %27 : vector<8x128xi1>, vector<8x128xf32>
    %37 = arith.addf %33, %36 : vector<8x128xf32>
    %c2_i32_4 = arith.constant 2 : i32
    %38 = vector.broadcast %c2_i32_4 : i32 to vector<8x128xi32>
    %39 = arith.cmpi slt, %1, %38 : vector<8x128xi32>
    %40 = arith.select %39, %0, %37 : vector<8x128xi1>, vector<8x128xf32>
    %c0_5 = arith.constant 0 : index
    %c0_6 = arith.constant 0 : index
    %41 = vector.load %arg3[%c0_5, %c0_6] : memref<8x128xf32, #tpu.memory_space<vmem>>, vector<8x128xf32>
    tpu.vector_store %arg3[%c0_5, %c0_6], %40 {strides = array<i32>} : memref<8x128xf32, #tpu.memory_space<vmem>>, vector<8x128xf32>,
    return
  }
  func.func @transform_0(%arg0: i32) -> i32 {
    %c0_i32 = arith.constant 0 : i32
    %c0_i32_0 = arith.constant 0 : i32
    return %c0_i32 : i32
  }
  func.func @transform_1(%arg0: i32) -> (i32, i32) {
    %c0_i32 = arith.constant 0 : i32
    %c0_i32_0 = arith.constant 0 : i32
    return %arg0, %c0_i32 : i32, i32
  }
  func.func @transform_2(%arg0: i32) -> (i32, i32) {
    %c0_i32 = arith.constant 0 : i32
    %c0_i32_0 = arith.constant 0 : i32
    return %arg0, %c0_i32 : i32, i32
  }
}

</mosaic_0001>

<bundles_post_ra>
// kernel: arima_forward.1
= control target key start
LH: loop header
LB: loop body
LE: loop exit
PB: predicated region body
PF: predicated region fallthrough
CT: control target
= control target key end

     0   :  { %7 = vsyncpa [#allocation5], 0  ;;  %s722_s0 = inlined_call_operand.vmem [shape: f32[6], index: 0, kind: input, shape index: {}]   ;;  %s723_s1 = inlined_call_operand.hbm [shape: f32[16,128], index: 1, kind: input, shape index: {}]   ;;  %s724_s2 = inlined_call_operand.hbm [shape: f32[16,128], index: 2, kind: output, shape index: {}]  }
   0x1   :  { %8 = vsyncpa [#allocation3], 0 }
   0x2   :  { %10 = vsyncpa [#allocation3 + $0x1], 0 }
   0x3   :  { %11 = vsyncpa [#allocation4], 0 }
   0x4   :  { %13 = vsyncpa [#allocation4 + $0x1], 0  ;;  %s526_s9 = smov 0   ;;  %s528_s10 = smov 0  }
   0x5   :  { %s530_s11 = smov 0   ;;  %s532_s12 = smov 0  }
   0x6 LB: > { %s547_s13 = sadd.s32 4294967295, %s503_s12   ;;  %s309_s14 = sadd.s32 4294967294, %s503_s12   ;;  %s503_s12 = sphi %s532_s12, %s745_s12   ;;  %s499_s11 = sphi %s530_s11, %s744_s11   ;;  %s495_s10 = sphi %s528_s10, %s743_s10   ;;  %s491_s9 = sphi %s526_s9, %s742_s9  }
   0x7   : > { %p60_p0 = scmp.ne.s32.totalorder %s495_s10, %s491_s9  ;;  %p725_p1 = scmp.eq.s32.totalorder %s547_s13, 0 }
   0x8   : > { %p90_p3 = scmp.eq.s32.totalorder %s309_s14, 1  ;;  %p310_p5 = scmp.ge.s32.totalorder %s503_s12, 1 }
   0x9   : > { %p556_p4 = por %p725_p1, %p60_p0  ;;  %p97_p7 = scmp.lt.s32.totalorder %s503_s12, 3 }
   0xa   : > { %p561_p6 = por %p90_p3, %p60_p0  ;;  %s110_s19 = sshll.u32 %s722_s0, 4  ;;  %s111_s19 = int_to_ptr.vmem [resolvable:$true] %s110_s19 }
   0xb   : > { %s728_s15 = scalar_select %p556_p4, 1, 0 }
   0xc   : > { %s729_s16 = scalar_select %p561_p6, 1, 0 }
   0xd   : > { %p569_p8 = pnand %p310_p5, %p97_p7  ;;  %s577_s21 = sadd.s32 1, %s503_s12  }
   0xe   : > { %s44_s23 = ssub.s32 %s503_s12, %s577_s21  ;;  %s47_s25 = sadd.s32 1, %s499_s11 }
   0xf   : > { %p336_p10 = pneg %p569_p8  ;;  %p587_p12 = scmp.eq.s32.totalorder %s44_s23, 0 }
  0x10   : > { %p54_p13 = scmp.ne.s32.totalorder %s499_s11, %s495_s10  ;;  %s388_s26 = scalar_lea.vmem %s111_s19, 16 }
  0x11   : > { %p581_p11 = pnand %p336_p10, %p725_p1  ;;  %p389_p0 = scmp.ne.s32.totalorder %s111_s19, %s388_s26 }
  0x12   : > { %p396_p9 = scmp.lt.s32.totalorder %s111_s19, %s111_s19  ;;  %p397_p2 = scmp.lt.s32.totalorder %s388_s26, %s388_s26 }
  0x13   : > { %p390_p3 = pneg %p581_p11 }
  0x14   : > { %p398_p10 = por %p397_p2, %p396_p9 }
  0x15   : > { %p391_p5 = pnand %p390_p3, %p389_p0 }
  0x17   : > { %p392_p7 = pneg %p391_p5 }
  0x19   : > { %p399_p1 = pnand %p398_p10, %p392_p7 }
  0x1b   : > { %402 = shalt.err (!%p399_p1)
}
  0x1c   : > { %s505_s27 = smov [#allocation2]   ;;  %p55_p2 = scmp.eq.s32.totalorder %s503_s12, 0 }
  0x1d   : > { %339 = dma.vmem_to_smem (!%p581_p11), %s111_s19, 16, %s505_s27, [#allocation5]  }
  0x1e   : > { %s601_s28 = scalar_select %p587_p12, %s499_s11, %s47_s25  }
  0x1f   : > { %p733_p1 = scmp.eq.s32.totalorder %s547_s13, 1  ;;  %p349_p0 = scmp.lt.s32.totalorder %s503_s12, 2 }
  0x20   : > { %s121_s30 = sand.u32 1, %s499_s11   ;;  %p56_p3 = por %p55_p2, %p54_p13 }
  0x21   : > { %p609_p9 = por %p733_p1, %p54_p13  ;;  %s313_s3 = sshll.u32 %s121_s30, 3 }
  0x22   : > { %s314_s4 = sshll.u32 %s503_s12, 7  ;;  %s125_s8 = scalar_lea.vmem [#allocation6], %s313_s3 }
  0x23   : > { %s734_s29 = scalar_select %p609_p9, 1, 0 }
  0x24   : > { %s622_s7 = scalar_lea.hbm %s723_s1, %s314_s4  ;;  %s132_s14 = sshll.u32 %s125_s8, 4  ;;  %s628_s14 = int_to_ptr.vmem [resolvable:$true] %s132_s14 }
  0x25   : > { %p624_p11 = pnand %p349_p0, %p56_p3  ;;  %s122_s18 = scalar_lea.sflag [#allocation3], %s121_s30 }
  0x26   : > { %s403_s19 = scalar_lea.hbm %s622_s7, 128  ;;  %s408_s24 = scalar_lea.hbm %s723_s1, 256 }
  0x27   : > { %p404_p12 = scmp.ne.s32.totalorder %s622_s7, %s403_s19  ;;  %p405_p13 = pneg %p624_p11 }
  0x28   : > { %p409_p10 = scmp.lt.u32.totalorder %s622_s7, %s723_s1  ;;  %p410_p2 = scmp.lt.u32.totalorder %s408_s24, %s403_s19 }
  0x29   : > { %p406_p5 = pnand %p405_p13, %p404_p12  ;;  %p412_p0 = scmp.lt.u32.totalorder %s403_s19, %s622_s7 }
  0x2a   : > { %p411_p1 = por %p410_p2, %p409_p10 }
  0x2b   : > { %p407_p7 = pneg %p406_p5 }
  0x2c   : > { %p413_p3 = por %p412_p0, %p411_p1 }
  0x2e   : > { %p414_p6 = pnand %p413_p3, %p407_p7 }
  0x30   : > { %417 = shalt.err (!%p414_p6)
}
  0x31   : > { %s418_s27 = scalar_lea.vmem %s628_s14, 128  ;;  %s506_s30 = smov [#allocation6]  }
  0x32   : > { %p419_p12 = scmp.ne.s32.totalorder %s628_s14, %s418_s27  ;;  %s423_s3 = sshll.u32 %s506_s30, 4  ;;  %s424_s3 = int_to_ptr.vmem [resolvable:$false] %s423_s3 }
  0x33   : > { %s425_s4 = scalar_lea.vmem %s424_s3, 256  ;;  %p426_p4 = scmp.lt.s32.totalorder %s628_s14, %s424_s3 }
  0x34   : > { %p421_p5 = pnand %p419_p12, %p405_p13  ;;  %p427_p10 = scmp.lt.s32.totalorder %s425_s4, %s418_s27 }
  0x36   : > { %p422_p9 = pneg %p421_p5  ;;  %p428_p2 = por %p427_p10, %p426_p4 }
  0x38   : > { %p429_p1 = pnand %p428_p2, %p422_p9 }
  0x3a   : > { %432 = shalt.err (!%p429_p1)
}
  0x3b   : > { %343 = dma.hbm_to_vmem [thread:$0]  (!%p624_p11), %s622_s7, 128, %s628_s14, %s122_s18  }
  0x3c   : > { %141 = sbr.rel (%p569_p8) target bundleno = 220 (0xdc), region = 28  ;;  %p736_p6 = scmp.eq.s32.totalorder (!%p569_p8), %s547_s13, 0 }
  0x43   : > { %478 = dma.done.wait (%p736_p6), [#allocation5], 16   ;;  %p737_p13 = pmov %p736_p6 }
  0x44   : > { %s662_s5 = sand.u32 1, %s495_s10   ;;  %p738_p4 = scmp.ne.s32.totalorder %s728_s15, 0 }
  0x45   : > { %480 = vsyncadd (%p737_p13), [#allocation5], 4294967280  ;;  %s317_s6 = sshll.u32 %s662_s5, 3  ;;  %s148_s8 = scalar_lea.sflag [#allocation3], %s662_s5 }
  0x46   : > { %s151_s7 = scalar_lea.vmem [#allocation6], %s317_s6 }
  0x47   : > { %482 = dma.done.wait (%p738_p4), %s148_s8, 128  }
  0x48   : > { %484 = vsyncadd (%p738_p4), %s148_s8, 4294967168 }
  0x49   : > { %156 = sfence }
  0x4a   : > { %v173_v0 = vld [vmem:[%s151_s7] sm:$0xff]  ;;  %s507_s20 = smov 1   ;;  %s508_s14 = smov 3   ;;  %v174_v2 = vlaneseq }
  0x4b   : > { %176 = vrot.lane.b32.xlu0 %v173_v0, %s507_s20  ;;  %196 = vrot.lane.b32.xlu1 %v173_v0, %s508_s14  ;;  %s509_s17 = smov 2   ;;  %s319_s18 = sld [smem:[#allocation2 + $0x2]] }
  0x4c   : > { %s321_s19 = sld [smem:[#allocation2 + $0x1]]  ;;  %s322_s22 = sld [smem:[#allocation2 + $0x3]]  ;;  %v175_v14 = vand.u32 127, %v174_v2 }
  0x4d   : > { %s198_s23 = sld [smem:[#allocation2]]  ;;  %s320_s24 = sld [smem:[#allocation2 + $0x4]] }
  0x4e   : > { %s323_s25 = sld [smem:[#allocation2 + $0x5]]  ;;  %vm203_vm0 = vcmp.ge.s32.totalorder %v175_v14, 5  ;;  %vm207_vm1 = vcmp.ge.s32.totalorder %v175_v14, 4  ;;  %s325_s15 = sshll.u32 %s547_s13, 7  ;;  %vm210_vm2 = vcmp.lt.s32.totalorder %v175_v14, 2 }
  0x4f   : > { %186 = vrot.lane.b32.xlu0 %v173_v0, %s509_s17  ;;  %s172_s26 = scalar_lea.vmem [#allocation7], %s317_s6  ;;  %s678_s4 = scalar_lea.hbm %s724_s2, %s325_s15 }
  0x50   : > { %s227_s27 = sshll.u32 %s172_s26, 4  ;;  %s214_s8 = scalar_lea.sflag [#allocation4], %s662_s5  ;;  %s680_s27 = int_to_ptr.vmem [resolvable:$true] %s227_s27 }
  0x51   : > { %v179_v3 = vstv %s319_s18  ;;  %s433_s13 = scalar_lea.vmem %s680_s27, 128  ;;  %p739_p9 = scmp.ne.s32.totalorder %s734_s29, 0 }
  0x52   : > { %v189_v4 = vstv %s321_s19  ;;  %v193_v5 = vstv %s322_s22  ;;  %p434_p8 = scmp.ne.s32.totalorder %s680_s27, %s433_s13  ;;  %s510_s6 = smov [#allocation7]  }
  0x53   : > { %v199_v6 = vstv %s198_s23  ;;  %v183_v8 = vstv %s320_s24  ;;  %s437_s7 = sshll.u32 %s510_s6, 4  ;;  %s438_s7 = int_to_ptr.vmem [resolvable:$false] %s437_s7 }
  0x54   : > { %v205_v18 = vstv %s323_s25  ;;  %p435_p11 = pnand %p434_p8, %p739_p9  ;;  %s439_s20 = scalar_lea.vmem %s438_s7, 256 }
  0x55   : > { %p440_p0 = scmp.lt.s32.totalorder %s680_s27, %s438_s7  ;;  %p441_p3 = scmp.lt.s32.totalorder %s439_s20, %s433_s13 }
  0x56   : > { %p436_p7 = pneg %p435_p11 }
  0x57   : > { %p442_p12 = por %p441_p3, %p440_p0 }
  0x59   : > { %p443_p5 = pnand %p442_p12, %p436_p7 }
  0xbd   : > { %v177_v1 = vpop.permute.xlu0 %176  ;;  %v197_v7 = vpop.permute.xlu1 %196 }
  0xbe   : > { %v180_v10 = vmul.f32 %v179_v3, %v177_v1  ;;  %v200_v13 = vmul.f32 %v199_v6, %v197_v7  ;;  %v184_v15 = vmul.f32 %v183_v8, %v177_v1 }
  0xc1   : > { %v187_v9 = vpop.permute.xlu0 %186 }
  0xc2   : > { %v190_v11 = vmul.f32 %v189_v4, %v187_v9  ;;  %v194_v12 = vmul.f32 %v193_v5, %v187_v9 }
  0xc4   : > { %v191_v16 = vadd.f32 %v190_v11, %v180_v10  ;;  %v195_v17 = vadd.f32 %v194_v12, %v184_v15 }
  0xc6   : > { %v201_v19 = vadd.f32 %v200_v13, %v191_v16  ;;  %v208_v22 = vsel %vm207_vm1, %v195_v17, 0.0 }
  0xc8   : > { %v204_v20 = vsel %vm203_vm0, %v201_v19, 0.0 }
  0xc9   : > { %v206_v21 = vadd.f32 %v205_v18, %v204_v20 }
  0xcb   : > { %v209_v23 = vadd.f32 %v208_v22, %v206_v21 }
  0xcd   : > { %v211_v24 = vsel %vm210_vm2, %v173_v0, %v209_v23 }
  0xce   : > { %212 = vst [vmem:[%s172_s26] sm:$0xff] %v211_v24 }
  0xcf   : > { %446 = shalt.err (!%p443_p5)
}
  0xd0   : > { %s447_s5 = scalar_lea.hbm %s678_s4, 128  ;;  %s451_s18 = scalar_lea.hbm %s724_s2, 256 }
  0xd1   : > { %p448_p10 = scmp.ne.s32.totalorder %s678_s4, %s447_s5  ;;  %p452_p6 = scmp.lt.u32.totalorder %s678_s4, %s724_s2 }
  0xd2   : > { %p453_p13 = scmp.lt.u32.totalorder %s451_s18, %s447_s5  ;;  %p455_p8 = scmp.lt.u32.totalorder %s447_s5, %s678_s4 }
  0xd3   : > { %p449_p2 = pnand %p448_p10, %p739_p9 }
  0xd4   : > { %p454_p4 = por %p453_p13, %p452_p6 }
  0xd5   : > { %p450_p1 = pneg %p449_p2 }
  0xd6   : > { %p456_p11 = por %p455_p8, %p454_p4 }
  0xd8   : > { %p457_p7 = pnand %p456_p11, %p450_p1 }
  0xda   : > { %460 = shalt.err (!%p457_p7)
}
  0xdb   : > { %334 = dma.vmem_to_hbm [thread:$0]  (%p739_p9), %s680_s27, 128, %s678_s4, %s214_s8  }
  0xdc PF: > { %s239_s23 = sand.u32 1, %s491_s9   ;;  %p740_p0 = scmp.ne.s32.totalorder %s729_s16, 0 }
  0xdd   : > { %p741_p3 = scmp.ge.s32.totalorder %s503_s12, 2  ;;  %s240_s24 = scalar_lea.sflag [#allocation4], %s239_s23 }
  0xdf   : > { %p345_p12 = pnand %p741_p3, %p740_p0 }
  0xe1   : > { %486 = dma.done.wait (!%p345_p12), %s240_s24, 128  }
  0xe2   : > { %488 = vsyncadd (!%p345_p12), %s240_s24, 4294967168  ;;  %p16_p5 = scmp.ge.s32.totalorder %s577_s21, 4   ;;  %s742_s9 = smov %s495_s10 }
  0xe3   : > { %s743_s10 = smov %s499_s11  ;;  %s744_s11 = smov %s601_s28 }
  0xe4   : > { %s745_s12 = smov %s577_s21  ;;  %18 = sbr.rel (!%p16_p5) target bundleno = 6 (0x6), region = 78 }
  0xeb   :  { %245 = vsyncpa [#allocation3], 1 }
  0xec   :  { %247 = vsyncpa [#allocation3 + $0x1], 1 }
  0xed   :  { %248 = vsyncpa [#allocation4], 1 }
  0xee   :  { %250 = vsyncpa [#allocation4 + $0x1], 1 }
  0xef   :  { %251 = vsyncpa [#allocation5], 1 }
  0xf0   :  { %253 = vsyncpa [#allocation5 + $0x1], 1 }

</bundles_post_ra>
